<compile_context>
chip_gen: v5e
topology: v5e:2x2
jax: 0.10.0
libtpu: 0.0.40
codegen_flags: <defaults>
</compile_context>

<pallas_src>
import jax
import jax.numpy as jnp
from jax.experimental import pallas as pl
from jax.experimental.pallas import tpu as pltpu


def _round_up(a: int, b: int) -> int:
    return -(-a // b) * b


def _wb_kernel(x_ref, g_ref, o_ref):
    # x_ref: VMEM (TR, TC) activation tile.
    # g_ref: VMEM (TR, 1) float32 per-row gains -> lane broadcast on the VPU.
    o_ref[...] = (x_ref[...] * g_ref[...]).astype(o_ref.dtype)


def white_balance(x: jax.Array, gains: jax.Array,
                  *, target_tile_bytes: int = 4 << 20) -> jax.Array:
    """x: [B, C, H, W], gains: [C] float32 -> [B, C, H, W] (same dtype as x)."""
    B, C, H, W = x.shape
    assert gains.shape == (C,)

    LANE = 128
    itemsize = jnp.dtype(x.dtype).itemsize
    SUB = max(8, 32 // itemsize)          # f32 -> 8, bf16 -> 16, int8/fp8 -> 32

    rows, cols = B * C, H * W

    # ---- Row tile: full extent when small (always a legal block shape), else a
    #      SUB-aligned cap with a masked partial last block (no padding pass).
    ROW_CAP = 512                          # multiple of 8/16/32
    tr = rows if rows <= ROW_CAP else ROW_CAP
    n_row_blocks = pl.cdiv(rows, tr)

    # ---- Column tile: ~target_tile_bytes per input buffer, 128-aligned, with a
    #      masked partial last block; full extent when a whole row fits.
    tc_budget = (target_tile_bytes // max(1, tr * itemsize)) // LANE * LANE
    tc_budget = max(LANE, min(tc_budget, 65536))
    if cols <= tc_budget:
        tc = cols                          # full extent -> single column block
    else:
        n_col_blocks = pl.cdiv(_round_up(cols, LANE), tc_budget)
        tc = _round_up(pl.cdiv(cols, n_col_blocks), LANE)
    n_col_blocks = pl.cdiv(cols, tc)

    # ---- v7x megacore: guarantee >= 2 grid blocks when possible so both
    #      TensorCores stream half the bytes (no effect on 1-TC v5e/v6e).
    if n_row_blocks * n_col_blocks == 1:
        if cols > LANE:
            tc = _round_up(pl.cdiv(cols, 2), LANE)
            n_col_blocks = pl.cdiv(cols, tc)
        elif rows > SUB:
            tr = _round_up(pl.cdiv(rows, 2), SUB)
            n_row_blocks = pl.cdiv(rows, tr)

    # Free 2-D views: contiguous reshape is a bitcast, no extra HBM passes.
    x2 = x.reshape(rows, cols)
    # Tiny [B*C, 1] float32 per-row gains column (row r = b*C + c -> gains[c]).
    g_rows = jnp.broadcast_to(gains[None, :], (B, C)).reshape(rows, 1)

    out2 = pl.pallas_call(
        _wb_kernel,
        out_shape=jax.ShapeDtypeStruct((rows, cols), x.dtype),
        grid=(n_row_blocks, n_col_blocks),
        in_specs=[
            pl.BlockSpec((tr, tc), lambda i, j: (i, j)),
            # Constant over the inner column axis -> DMA skipped on revisits.
            pl.BlockSpec((tr, 1), lambda i, j: (i, 0)),
        ],
        out_specs=pl.BlockSpec((tr, tc), lambda i, j: (i, j)),
        compiler_params=pltpu.CompilerParams(
            dimension_semantics=("parallel", "parallel"),
            vmem_limit_bytes=32 * 1024 * 1024,
        ),
    )(x2, g_rows)

    # TODO(synk): for bf16/fp8 inputs PyTorch would promote the output to f32
    # (fp32 parameter * low-precision tensor); here the output keeps x.dtype.
    return out2.reshape(B, C, H, W)


if __name__ == "__main__":
    # Deterministic init matching nn.Parameter(torch.tensor((1.2, 1.0, 0.9))).
    gains = jnp.array([1.2, 1.0, 0.9], dtype=jnp.float32)

    key = jax.random.PRNGKey(0)

    # Small NCHW input consistent with the module (C=3 RGB white balance).
    x = jax.random.normal(key, (2, 3, 16, 16), dtype=jnp.float32)
    y = jax.block_until_ready(white_balance(x, gains))
    y_ref = x * gains.reshape(1, -1, 1, 1)
    assert y.shape == x.shape and y.dtype == x.dtype
    assert jnp.allclose(y, y_ref, atol=1e-6, rtol=1e-6)

    # Odd spatial size exercises the masked partial edge-block path (no padding).
    x_odd = jax.random.normal(jax.random.PRNGKey(1), (2, 3, 17, 19), dtype=jnp.float32)
    y_odd = jax.block_until_ready(white_balance(x_odd, gains))
    y_odd_ref = x_odd * gains.reshape(1, -1, 1, 1)
    assert jnp.allclose(y_odd, y_odd_ref, atol=1e-6, rtol=1e-6)

    print("KERNEL_OK")
</pallas_src>

<mosaic_0001>
module attributes {stable_mosaic.version = 11 : i64} {
  func.func @_wb_kernel(%arg0: i32, %arg1: i32, %arg2: memref<6x128xf32, #tpu.memory_space<vmem>>, %arg3: memref<6x1xf32, #tpu.memory_space<vmem>>, %arg4: memref<6x128xf32, #tpu.memory_space<vmem>>) attributes {dimension_semantics = [#tpu.dimension_semantics<parallel>, #tpu.dimension_semantics<parallel>], iteration_bounds = array<i64: 1, 2>, scalar_prefetch = 0 : i64, scratch_operands = 0 : i64, tpu.core_type = #tpu.core_type<tc>, window_params = [{transform_indices = @transform_0, window_bounds = array<i64: 6, 128>}, {transform_indices = @transform_1, window_bounds = array<i64: 6, 1>}, {transform_indices = @transform_2, window_bounds = array<i64: 6, 128>}]} {
    %c0 = arith.constant 0 : index
    %c0_0 = arith.constant 0 : index
    %0 = vector.load %arg2[%c0, %c0_0] : memref<6x128xf32, #tpu.memory_space<vmem>>, vector<6x128xf32>
    %c0_1 = arith.constant 0 : index
    %c0_2 = arith.constant 0 : index
    %1 = vector.load %arg3[%c0_1, %c0_2] : memref<6x1xf32, #tpu.memory_space<vmem>>, vector<6x1xf32>
    %2 = vector.broadcast %1 : vector<6x1xf32> to vector<6x128xf32>
    %3 = arith.mulf %0, %2 : vector<6x128xf32>
    %c0_3 = arith.constant 0 : index
    %c0_4 = arith.constant 0 : index
    %4 = vector.load %arg4[%c0_3, %c0_4] : memref<6x128xf32, #tpu.memory_space<vmem>>, vector<6x128xf32>
    tpu.vector_store %arg4[%c0_3, %c0_4], %3 {strides = array<i32>} : memref<6x128xf32, #tpu.memory_space<vmem>>, vector<6x128xf32>,
    return
  }
  func.func @transform_0(%arg0: i32, %arg1: i32) -> (i32, i32) {
    %c0_i32 = arith.constant 0 : i32
    return %arg0, %arg1 : i32, i32
  }
  func.func @transform_1(%arg0: i32, %arg1: i32) -> (i32, i32) {
    %c0_i32 = arith.constant 0 : i32
    %c0_i32_0 = arith.constant 0 : i32
    return %arg0, %c0_i32 : i32, i32
  }
  func.func @transform_2(%arg0: i32, %arg1: i32) -> (i32, i32) {
    %c0_i32 = arith.constant 0 : i32
    return %arg0, %arg1 : i32, i32
  }
}

</mosaic_0001>

<bundles_post_ra>
// kernel: tpu_custom_call.1
= control target key start
LH: loop header
LB: loop body
LE: loop exit
PB: predicated region body
PF: predicated region fallthrough
CT: control target
= control target key end

     0   :  { %7 = vsyncpa [#allocation3], 0  ;;  %s651_s0 = inlined_call_operand.hbm [shape: f32[6,256], index: 0, kind: input, shape index: {}]   ;;  %s652_s1 = inlined_call_operand.vmem [shape: f32[6,1], index: 1, kind: input, shape index: {}]   ;;  %s653_s2 = inlined_call_operand.hbm [shape: f32[6,256], index: 2, kind: output, shape index: {}]  }
   0x1   :  { %9 = vsyncpa [#allocation3 + $0x1], 0 }
   0x2   :  { %10 = vsyncpa [#allocation4], 0 }
   0x3   :  { %12 = vsyncpa [#allocation4 + $0x1], 0  ;;  %s528_s9 = smov 0   ;;  %s530_s10 = smov 0  }
   0x4   :  { %s532_s11 = smov 0   ;;  %s534_s12 = smov 0  }
   0x5   :  { %s536_s13 = smov 0   ;;  %s538_s14 = smov 0  }
   0x6 LB: > { %s320_s15 = sadd.s32 4294967295, %s510_s14   ;;  %s321_s16 = sadd.s32 4294967294, %s510_s14   ;;  %s510_s14 = sphi %s538_s14, %s18_s14   ;;  %s506_s13 = sphi %s536_s13, %s662_s13   ;;  %s502_s12 = sphi %s534_s12, %s661_s12   ;;  %s498_s11 = sphi %s532_s11, %s660_s11   ;;  %s494_s10 = sphi %s530_s10, %s659_s10   ;;  %s490_s9 = sphi %s528_s9, %s658_s9  }
   0x7   : > { %s27_s17 = sadd.s32 1, %s506_s13  ;;  %s39_s18 = sadd.s32 1, %s498_s11 }
   0x8   : > { %p28_p0 = scmp.ge.s32.totalorder %s27_s17, 2  ;;  %p46_p1 = scmp.ne.s32.totalorder %s498_s11, %s494_s10 }
   0x9   : > { %p47_p2 = scmp.eq.s32.totalorder %s510_s14, 0  ;;  %p52_p3 = scmp.ne.s32.totalorder %s494_s10, %s490_s9 }
   0xa   : > { %s664_s17 = smov (%p28_p0, %s27_s17), 0  ;;  %p53_p5 = scmp.eq.s32.totalorder %s320_s15, 0 }
   0xb   : > { %p569_p4 = por %p47_p2, %p46_p1  ;;  %s35_s20 = ssub.s32 %s506_s13, %s664_s17 }
   0xc   : > { %p104_p6 = scmp.eq.s32.totalorder %s320_s15, 1  ;;  %p37_p7 = scmp.eq.s32.totalorder %s35_s20, 0 }
   0xd   : > { %p575_p8 = por %p53_p5, %p52_p3  ;;  %p110_p10 = scmp.eq.s32.totalorder %s321_s16, 1 }
   0xe   : > { %p579_p9 = por %p104_p6, %p46_p1  ;;  %p324_p12 = scmp.ge.s32.totalorder %s510_s14, 2 }
   0xf   : > { %s584_s23 = scalar_select %p37_p7, %s498_s11, %s39_s18  }
  0x10   : > { %p586_p11 = por %p110_p10, %p52_p3  ;;  %p346_p13 = scmp.lt.s32.totalorder %s510_s14, 2 }
  0x11   : > { %s137_s25 = sand.u32 1, %s498_s11   ;;  %s326_s27 = sshll.u32 %s506_s13, 3 }
  0x12   : > { %s325_s26 = sshll.u32 %s137_s25, 3  ;;  %s147_s30 = scalar_lea.hbm %s651_s0, %s326_s27 }
  0x13   : > { %s141_s3 = scalar_lea.vmem [#allocation2], %s325_s26  ;;  %s149_s5 = sshll.u32 %s147_s30, 4  ;;  %s150_s5 = int_to_ptr.hbm [resolvable:$true] %s149_s5 }
  0x14   : > { %s151_s4 = sshll.u32 %s141_s3, 4  ;;  %p339_p0 = pnand %p346_p13, %p569_p4  ;;  %s152_s4 = int_to_ptr.vmem [resolvable:$true] %s151_s4 }
  0x15   : > { %p327_p1 = scmp.ge.s32.totalorder %s510_s14, 1  ;;  %p156_p2 = scmp.lt.s32.totalorder %s510_s14, 3 }
  0x16   : > { %s138_s6 = scalar_lea.sflag [#allocation3], %s137_s25 }
  0x17   : > { %341 = dma.hbm_to_vmem [thread:$0]  (!%p339_p0), %s150_s5, 128, %s152_s4, %s138_s6  }
  0x18   : > { %p157_p3 = pnand %p327_p1, %p156_p2 }
  0x19   : > { %s602_s7 = sand.u32 (!%p157_p3), 1, %s494_s10  }
  0x1a   : > { %160 = sbr.rel (%p157_p3) target bundleno = 154 (0x9a), region = 28  ;;  %s328_s8 = sshll.u32 (!%p157_p3), %s602_s7, 3 }
  0x1b   : > { %s163_s15 = scalar_lea.sflag (!%p157_p3), [#allocation3], %s602_s7  ;;  %s166_s16 = scalar_lea.vmem (!%p157_p3), [#allocation2], %s328_s8 }
  0x1f   : > { %481 = dma.done.wait (%p575_p8), %s163_s15, 128  }
  0x20   : > { %483 = vsyncadd (%p575_p8), %s163_s15, 4294967168  ;;  %v512_v0 = vmov 0   ;;  %v197_v1 = vld [vmem:[%s652_s1] sm:$0x3f]  ;;  %s331_s20 = sshll.u32 %s502_s12, 3  ;;  %s191_s28 = scalar_lea.vmem [#allocation5], %s328_s8 }
  0x21   : > { %397 = vset.pattern.permute.xlu0 %v512_v0  ;;  %s218_s27 = scalar_lea.hbm %s653_s2, %s331_s20  ;;  %v196_v2 = vld [vmem:[%s166_s16] sm:$0x3f]  ;;  %s220_s29 = sshll.u32 %s191_s28, 4  ;;  %s221_s29 = int_to_ptr.vmem [resolvable:$true] %s220_s29 }
  0x22   : > { %200 = vperm.xlu0 %397, %v197_v1   ;;  %s222_s21 = sshll.u32 %s218_s27, 4  ;;  %s206_s30 = scalar_lea.sflag [#allocation4], %s602_s7  ;;  %s223_s21 = int_to_ptr.hbm [resolvable:$true] %s222_s21 }
  0x23   : > { %s442_s3 = sshra.s32 %s223_s21, 4  ;;  %s448_s6 = scalar_lea.hbm %s653_s2, 16  ;;  %s443_s3 = int_to_ptr.hbm [resolvable:$true] %s442_s3 }
  0x24   : > { %s444_s4 = scalar_lea.hbm %s443_s3, 8  ;;  %p449_p7 = scmp.lt.s32.totalorder %s443_s3, %s653_s2 }
  0x25   : > { %p445_p4 = scmp.ne.s32.totalorder %s443_s3, %s444_s4  ;;  %p450_p8 = scmp.lt.s32.totalorder %s448_s6, %s444_s4 }
  0x27   : > { %p446_p5 = pnand %p445_p4, %p579_p9  ;;  %p451_p10 = por %p450_p8, %p449_p7 }
  0x29   : > { %p447_p6 = pneg %p446_p5 }
  0x2b   : > { %p452_p13 = pnand %p451_p10, %p447_p6 }
  0x94   : > { %v201_v3 = vpop.permute.xlu0 %200 }
  0x95   : > { %v203_v4 = vmul.f32 %v201_v3, %v196_v2 }
  0x97   : > { %204 = vst [vmem:[%s191_s28] sm:$0x3f] %v203_v4 }
  0x98   : > { %455 = shalt.err (!%p452_p13)
}
  0x99   : > { %336 = dma.vmem_to_hbm [thread:$0]  (%p579_p9), %s221_s29, 128, %s223_s21, %s206_s30  }
  0x9a PF: > { %s234_s7 = sand.u32 1, %s490_s9   ;;  %p343_p0 = pnand %p324_p12, %p586_p11 }
  0x9b   : > { %s235_s16 = scalar_lea.sflag [#allocation4], %s234_s7 }
  0x9c   : > { %p344_p1 = pneg %p343_p0 }
  0x9e   : > { %485 = dma.done.wait (%p344_p1), %s235_s16, 128  }
  0x9f   : > { %487 = vsyncadd (%p344_p1), %s235_s16, 4294967168  ;;  %s18_s14 = sadd.s32 1, %s510_s14   ;;  %s658_s9 = smov %s494_s10 }
  0xa0   : > { %p15_p2 = scmp.ge.s32.totalorder %s18_s14, 4   ;;  %s659_s10 = smov %s498_s11 }
  0xa1   : > { %s660_s11 = smov %s584_s23  ;;  %s661_s12 = smov %s506_s13 }
  0xa2   : > { %s662_s13 = smov %s664_s17  ;;  %17 = sbr.rel (!%p15_p2) target bundleno = 6 (0x6), region = 76 }
  0xa7   :  { %241 = vsyncpa [#allocation3], 1 }
  0xa8   :  { %243 = vsyncpa [#allocation3 + $0x1], 1 }
  0xa9   :  { %244 = vsyncpa [#allocation4], 1 }
  0xaa   :  { %246 = vsyncpa [#allocation4 + $0x1], 1 }

</bundles_post_ra>
